<compile_context>
chip_gen: v5e
topology: v5e:2x2
jax: 0.10.0
libtpu: 0.0.40
codegen_flags: <defaults>
</compile_context>

<pallas_src>
import functools
import math

import jax
import jax.numpy as jnp
from jax import lax
from jax.experimental import pallas as pl
from jax.experimental.pallas import tpu as pltpu


def _round_up(x, m):
    return ((x + m - 1) // m) * m


def mlp_kernel(x_ref, w1_ref, b1_ref, w2_ref, b2_ref, w3_ref, b3_ref, o_ref,
               *, out_dim):
    # x: [TB, K1p] bf16; w1: [K1p, Hp] bf16; w2: [Hp, Hp] bf16; w3: [Hp, Np] bf16
    # b1/b2: [1, Hp] f32; b3: [1, Np] f32; o: [TB, Np] f32
    x = x_ref[...]

    # Layer 1: Linear + ReLU (bf16 operands on the MXU, f32 accumulate).
    h1 = jnp.dot(x, w1_ref[...], preferred_element_type=jnp.float32) + b1_ref[...]
    h1 = jnp.maximum(h1, 0.0)

    # Layer 2: Linear + ReLU
    h2 = jnp.dot(h1.astype(jnp.bfloat16), w2_ref[...],
                 preferred_element_type=jnp.float32) + b2_ref[...]
    h2 = jnp.maximum(h2, 0.0)

    # Layer 3: Linear
    logits = jnp.dot(h2.astype(jnp.bfloat16), w3_ref[...],
                     preferred_element_type=jnp.float32) + b3_ref[...]

    # Mask padded output lanes so they contribute exp(-inf)=0 to the softmax.
    col = lax.broadcasted_iota(jnp.int32, logits.shape, dimension=1)
    logits = jnp.where(col < out_dim, logits, -jnp.inf)

    # Numerically stable softmax over the (padded) feature axis.
    m = jnp.max(logits, axis=-1, keepdims=True)
    e = jnp.exp(logits - m)
    denom = jnp.sum(e, axis=-1, keepdims=True)
    o_ref[...] = (e * pl.reciprocal(denom, approx=True)).astype(o_ref.dtype)


def mlp_forward(x, params, *, batch_tile=512):
    """x: [B, d1, d2]  ->  probs: [B, out_dim] (f32)."""
    w1, b1, w2, b2, w3, b3 = params
    B = x.shape[0]
    x_flat = jnp.reshape(x, (B, x.shape[1] * x.shape[2]))  # torch.reshape equivalent

    in_dim, hidden = w1.shape
    out_dim = w3.shape[1]

    # Pad feature dims to lane multiples (128); batch tile to a sublane multiple (8).
    K1 = _round_up(in_dim, 128)
    H = _round_up(hidden, 128)
    N = _round_up(out_dim, 128)
    TB = min(batch_tile, _round_up(B, 8))
    Bp = _round_up(B, TB)

    f32, bf16 = jnp.float32, jnp.bfloat16

    # Zero padding is semantics-preserving: padded input cols meet padded
    # weight rows (contribute 0); padded hidden cols get 0 bias -> relu(0)=0
    # and are killed by zero rows of the next weight; padded output cols are
    # masked to -inf inside the kernel before the softmax.
    xp = jnp.zeros((Bp, K1), bf16).at[:B, :in_dim].set(x_flat.astype(bf16))
    w1p = jnp.zeros((K1, H), bf16).at[:in_dim, :hidden].set(w1.astype(bf16))
    w2p = jnp.zeros((H, H), bf16).at[:hidden, :hidden].set(w2.astype(bf16))
    w3p = jnp.zeros((H, N), bf16).at[:hidden, :out_dim].set(w3.astype(bf16))
    b1p = jnp.zeros((1, H), f32).at[0, :hidden].set(b1.astype(f32))
    b2p = jnp.zeros((1, H), f32).at[0, :hidden].set(b2.astype(f32))
    b3p = jnp.zeros((1, N), f32).at[0, :out_dim].set(b3.astype(f32))

    grid = (Bp // TB,)

    # Weights/biases: constant index_map -> resident in VMEM across the grid.
    resident = lambda shape: pl.BlockSpec(shape, lambda i: (0, 0))

    # VMEM budget: resident bf16 weights + f32 biases, double-buffered x/out
    # tiles, f32 intermediates; 1.5x margin, floor 32 MiB, cap under v7x's
    # 64 MiB physical VMEM per TensorCore.
    weight_bytes = (K1 * H + H * H + H * N) * 2 + (2 * H + N) * 4
    tile_bytes = TB * (K1 * 2 + N * 4) * 2
    interm_bytes = TB * (2 * H + N) * 4
    needed = int((weight_bytes + tile_bytes + interm_bytes) * 1.5) + (4 << 20)
    vmem_limit = min(max(needed, 32 * 1024 * 1024), 60 * 1024 * 1024)

    out_padded = pl.pallas_call(
        functools.partial(mlp_kernel, out_dim=out_dim),
        out_shape=jax.ShapeDtypeStruct((Bp, N), jnp.float32),
        grid=grid,
        in_specs=[
            pl.BlockSpec((TB, K1), lambda i: (i, 0)),   # x: tiled over batch
            resident((K1, H)),
            resident((1, H)),
            resident((H, H)),
            resident((1, H)),
            resident((H, N)),
            resident((1, N)),
        ],
        out_specs=pl.BlockSpec((TB, N), lambda i: (i, 0)),
        compiler_params=pltpu.CompilerParams(
            dimension_semantics=("parallel",),
            vmem_limit_bytes=vmem_limit,
        ),
    )(xp, w1p, b1p, w2p, b2p, w3p, b3p)

    return out_padded[:B, :out_dim]


def mlp_reference(x, params):
    """Pure-JAX f32 reference matching the PyTorch forward."""
    w1, b1, w2, b2, w3, b3 = params
    xf = jnp.reshape(x, (x.shape[0], -1))
    h1 = jnp.maximum(xf @ w1 + b1, 0.0)
    h2 = jnp.maximum(h1 @ w2 + b2, 0.0)
    return jax.nn.softmax(h2 @ w3 + b3, axis=-1)


def init_params(key, in_dim, hidden_dim, out_dim):
    """Deterministic init mimicking torch.nn.Linear (uniform +/- 1/sqrt(fan_in))."""
    ks = jax.random.split(key, 6)

    def linear(kw, kb, fan_in, fan_out):
        bound = 1.0 / math.sqrt(fan_in)
        w = jax.random.uniform(kw, (fan_in, fan_out), jnp.float32, -bound, bound)
        b = jax.random.uniform(kb, (fan_out,), jnp.float32, -bound, bound)
        return w, b

    w1, b1 = linear(ks[0], ks[1], in_dim, hidden_dim)
    w2, b2 = linear(ks[2], ks[3], hidden_dim, hidden_dim)
    w3, b3 = linear(ks[4], ks[5], hidden_dim, out_dim)
    return (w1, b1, w2, b2, w3, b3)


if __name__ == "__main__":
    key = jax.random.PRNGKey(0)
    k_x, k_p = jax.random.split(key)

    # Small shapes consistent with the forward: x is 3-D, flattened to (B, d1*d2).
    B, d1, d2 = 2, 4, 16
    in_dim = d1 * d2        # 64
    hidden_dim = 32
    out_dim = 8

    x = jax.random.normal(k_x, (B, d1, d2), dtype=jnp.float32)
    params = init_params(k_p, in_dim, hidden_dim, out_dim)

    out = mlp_forward(x, params)
    out = jax.block_until_ready(out)
    ref = mlp_reference(x, params)

    assert out.shape == (B, out_dim)
    # Softmax rows sum to 1 (approx reciprocal -> loose tolerance).
    assert bool(jnp.allclose(jnp.sum(out, axis=-1), 1.0, atol=5e-3))
    # Matches f32 reference within bf16-operand tolerance.
    assert bool(jnp.allclose(out, ref, atol=2e-2))

    print("KERNEL_OK")
</pallas_src>

<mosaic_0001>
module attributes {stable_mosaic.version = 11 : i64} {
  func.func @mlp_kernel(%arg0: i32, %arg1: memref<8x128xbf16, #tpu.memory_space<vmem>>, %arg2: memref<128x128xbf16, #tpu.memory_space<vmem>>, %arg3: memref<1x128xf32, #tpu.memory_space<vmem>>, %arg4: memref<128x128xbf16, #tpu.memory_space<vmem>>, %arg5: memref<1x128xf32, #tpu.memory_space<vmem>>, %arg6: memref<128x128xbf16, #tpu.memory_space<vmem>>, %arg7: memref<1x128xf32, #tpu.memory_space<vmem>>, %arg8: memref<8x128xf32, #tpu.memory_space<vmem>>) attributes {dimension_semantics = [#tpu.dimension_semantics<parallel>], iteration_bounds = array<i64: 1>, scalar_prefetch = 0 : i64, scratch_operands = 0 : i64, tpu.core_type = #tpu.core_type<tc>, window_params = [{transform_indices = @transform_0, window_bounds = array<i64: 8, 128>}, {pipeline_mode = #tpu.pipeline_mode<synchronous>, transform_indices = @transform_1, window_bounds = array<i64: 128, 128>}, {pipeline_mode = #tpu.pipeline_mode<synchronous>, transform_indices = @transform_2, window_bounds = array<i64: 1, 128>}, {pipeline_mode = #tpu.pipeline_mode<synchronous>, transform_indices = @transform_3, window_bounds = array<i64: 128, 128>}, {pipeline_mode = #tpu.pipeline_mode<synchronous>, transform_indices = @transform_4, window_bounds = array<i64: 1, 128>}, {pipeline_mode = #tpu.pipeline_mode<synchronous>, transform_indices = @transform_5, window_bounds = array<i64: 128, 128>}, {pipeline_mode = #tpu.pipeline_mode<synchronous>, transform_indices = @transform_6, window_bounds = array<i64: 1, 128>}, {transform_indices = @transform_7, window_bounds = array<i64: 8, 128>}]} {
    %c0 = arith.constant 0 : index
    %c0_0 = arith.constant 0 : index
    %0 = vector.load %arg1[%c0, %c0_0] : memref<8x128xbf16, #tpu.memory_space<vmem>>, vector<8x128xbf16>
    %c0_1 = arith.constant 0 : index
    %c0_2 = arith.constant 0 : index
    %1 = vector.load %arg2[%c0_1, %c0_2] : memref<128x128xbf16, #tpu.memory_space<vmem>>, vector<128x128xbf16>
    %cst = arith.constant dense<0.000000e+00> : vector<8x128xf32>
    %2 = tpu.matmul %0, %1, %cst {dimension_numbers = #tpu.dot_dimension_numbers<[1], [0], [0], [1], [0, 0, 1, 1], [], []>} : vector<8x128xbf16>, vector<128x128xbf16>, vector<8x128xf32> -> vector<8x128xf32>
    %c0_3 = arith.constant 0 : index
    %c0_4 = arith.constant 0 : index
    %3 = vector.load %arg3[%c0_3, %c0_4] : memref<1x128xf32, #tpu.memory_space<vmem>>, vector<1x128xf32>
    %4 = vector.broadcast %3 : vector<1x128xf32> to vector<8x128xf32>
    %5 = arith.addf %2, %4 : vector<8x128xf32>
    %cst_5 = arith.constant 0.000000e+00 : f32
    %6 = vector.broadcast %cst_5 : f32 to vector<8x128xf32>
    %7 = arith.maximumf %5, %6 : vector<8x128xf32>
    %8 = arith.truncf %7 : vector<8x128xf32> to vector<8x128xbf16>
    %c0_6 = arith.constant 0 : index
    %c0_7 = arith.constant 0 : index
    %9 = vector.load %arg4[%c0_6, %c0_7] : memref<128x128xbf16, #tpu.memory_space<vmem>>, vector<128x128xbf16>
    %cst_8 = arith.constant dense<0.000000e+00> : vector<8x128xf32>
    %10 = tpu.matmul %8, %9, %cst_8 {dimension_numbers = #tpu.dot_dimension_numbers<[1], [0], [0], [1], [0, 0, 1, 1], [], []>} : vector<8x128xbf16>, vector<128x128xbf16>, vector<8x128xf32> -> vector<8x128xf32>
    %c0_9 = arith.constant 0 : index
    %c0_10 = arith.constant 0 : index
    %11 = vector.load %arg5[%c0_9, %c0_10] : memref<1x128xf32, #tpu.memory_space<vmem>>, vector<1x128xf32>
    %12 = vector.broadcast %11 : vector<1x128xf32> to vector<8x128xf32>
    %13 = arith.addf %10, %12 : vector<8x128xf32>
    %cst_11 = arith.constant 0.000000e+00 : f32
    %14 = vector.broadcast %cst_11 : f32 to vector<8x128xf32>
    %15 = arith.maximumf %13, %14 : vector<8x128xf32>
    %16 = arith.truncf %15 : vector<8x128xf32> to vector<8x128xbf16>
    %c0_12 = arith.constant 0 : index
    %c0_13 = arith.constant 0 : index
    %17 = vector.load %arg6[%c0_12, %c0_13] : memref<128x128xbf16, #tpu.memory_space<vmem>>, vector<128x128xbf16>
    %cst_14 = arith.constant dense<0.000000e+00> : vector<8x128xf32>
    %18 = tpu.matmul %16, %17, %cst_14 {dimension_numbers = #tpu.dot_dimension_numbers<[1], [0], [0], [1], [0, 0, 1, 1], [], []>} : vector<8x128xbf16>, vector<128x128xbf16>, vector<8x128xf32> -> vector<8x128xf32>
    %c0_15 = arith.constant 0 : index
    %c0_16 = arith.constant 0 : index
    %19 = vector.load %arg7[%c0_15, %c0_16] : memref<1x128xf32, #tpu.memory_space<vmem>>, vector<1x128xf32>
    %20 = vector.broadcast %19 : vector<1x128xf32> to vector<8x128xf32>
    %21 = arith.addf %18, %20 : vector<8x128xf32>
    %22 = tpu.iota {dimensions = array<i32: 1>} : vector<8x128xi32>
    %c8_i32 = arith.constant 8 : i32
    %23 = vector.broadcast %c8_i32 : i32 to vector<8x128xi32>
    %24 = arith.cmpi slt, %22, %23 : vector<8x128xi32>
    %cst_17 = arith.constant 0xFF800000 : f32
    %25 = vector.broadcast %cst_17 : f32 to vector<8x128xf32>
    %26 = arith.select %24, %21, %25 : vector<8x128xi1>, vector<8x128xf32>
    %cst_18 = arith.constant dense<0xFF800000> : vector<8xf32>
    %27 = vector.multi_reduction <maximumf>, %26, %cst_18 [1] : vector<8x128xf32> to vector<8xf32>
    %28 = vector.shape_cast %27 : vector<8xf32> to vector<8x1xf32>
    %29 = vector.broadcast %28 : vector<8x1xf32> to vector<8x128xf32>
    %30 = arith.subf %26, %29 : vector<8x128xf32>
    %31 = math.exp %30 : vector<8x128xf32>
    %cst_19 = arith.constant dense<0.000000e+00> : vector<8xf32>
    %32 = vector.multi_reduction <add>, %31, %cst_19 [1] : vector<8x128xf32> to vector<8xf32>
    %33 = vector.shape_cast %32 : vector<8xf32> to vector<8x1xf32>
    %34 = tpu.reciprocal %33 {approx = true} : vector<8x1xf32> -> vector<8x1xf32>
    %35 = vector.broadcast %34 : vector<8x1xf32> to vector<8x128xf32>
    %36 = arith.mulf %31, %35 : vector<8x128xf32>
    %c0_20 = arith.constant 0 : index
    %c0_21 = arith.constant 0 : index
    %37 = vector.load %arg8[%c0_20, %c0_21] : memref<8x128xf32, #tpu.memory_space<vmem>>, vector<8x128xf32>
    tpu.vector_store %arg8[%c0_20, %c0_21], %36 {strides = array<i32>} : memref<8x128xf32, #tpu.memory_space<vmem>>, vector<8x128xf32>,
    return
  }
  func.func @transform_0(%arg0: i32) -> (i32, i32) {
    %c0_i32 = arith.constant 0 : i32
    %c0_i32_0 = arith.constant 0 : i32
    return %arg0, %c0_i32 : i32, i32
  }
  func.func @transform_1(%arg0: i32) -> (i32, i32) {
    %c0_i32 = arith.constant 0 : i32
    %c0_i32_0 = arith.constant 0 : i32
    %c0_i32_1 = arith.constant 0 : i32
    return %c0_i32, %c0_i32_0 : i32, i32
  }
  func.func @transform_2(%arg0: i32) -> (i32, i32) {
    %c0_i32 = arith.constant 0 : i32
    %c0_i32_0 = arith.constant 0 : i32
    %c0_i32_1 = arith.constant 0 : i32
    return %c0_i32, %c0_i32_0 : i32, i32
  }
  func.func @transform_3(%arg0: i32) -> (i32, i32) {
    %c0_i32 = arith.constant 0 : i32
    %c0_i32_0 = arith.constant 0 : i32
    %c0_i32_1 = arith.constant 0 : i32
    return %c0_i32, %c0_i32_0 : i32, i32
  }
  func.func @transform_4(%arg0: i32) -> (i32, i32) {
    %c0_i32 = arith.constant 0 : i32
    %c0_i32_0 = arith.constant 0 : i32
    %c0_i32_1 = arith.constant 0 : i32
    return %c0_i32, %c0_i32_0 : i32, i32
  }
  func.func @transform_5(%arg0: i32) -> (i32, i32) {
    %c0_i32 = arith.constant 0 : i32
    %c0_i32_0 = arith.constant 0 : i32
    %c0_i32_1 = arith.constant 0 : i32
    return %c0_i32, %c0_i32_0 : i32, i32
  }
  func.func @transform_6(%arg0: i32) -> (i32, i32) {
    %c0_i32 = arith.constant 0 : i32
    %c0_i32_0 = arith.constant 0 : i32
    %c0_i32_1 = arith.constant 0 : i32
    return %c0_i32, %c0_i32_0 : i32, i32
  }
  func.func @transform_7(%arg0: i32) -> (i32, i32) {
    %c0_i32 = arith.constant 0 : i32
    %c0_i32_0 = arith.constant 0 : i32
    return %arg0, %c0_i32 : i32, i32
  }
}

</mosaic_0001>

<bundles_post_ra>
// kernel: tpu_custom_call.1
= control target key start
LH: loop header
LB: loop body
LE: loop exit
PB: predicated region body
PF: predicated region fallthrough
CT: control target
= control target key end

     0   :  { %12 = vsyncpa [#allocation3], 0  ;;  %s702_s0 = inlined_call_operand.hbm [shape: bf16[8,128], index: 0, kind: input, shape index: {}]   ;;  %s703_s1 = inlined_call_operand.hbm [shape: bf16[128,128], index: 1, kind: input, shape index: {}]   ;;  %s704_s2 = inlined_call_operand.vmem [shape: f32[1,128], index: 2, kind: input, shape index: {}]   ;;  %s705_s3 = inlined_call_operand.hbm [shape: bf16[128,128], index: 3, kind: input, shape index: {}]   ;;  %s706_s4 = inlined_call_operand.vmem [shape: f32[1,128], index: 4, kind: input, shape index: {}]   ;;  %s707_s5 = inlined_call_operand.hbm [shape: bf16[128,128], index: 5, kind: input, shape index: {}]   ;;  %s708_s6 = inlined_call_operand.vmem [shape: f32[1,128], index: 6, kind: input, shape index: {}]   ;;  %s709_s7 = inlined_call_operand.hbm [shape: f32[8,128], index: 7, kind: output, shape index: {}]  }
   0x1   :  { %13 = vsyncpa [#allocation6], 0 }
   0x2   :  { %14 = vsyncpa [#allocation9], 0  ;;  %s31_s26 = sshll.u32 %s703_s1, 4  ;;  %s32_s26 = int_to_ptr.hbm [resolvable:$true] %s31_s26 }
   0x3   :  { %15 = vsyncpa [#allocation4], 0  ;;  %s631_s27 = smov [#allocation5]   ;;  %s21_s8 = sshll.u32 %s702_s0, 4  ;;  %s22_s8 = int_to_ptr.hbm [resolvable:$true] %s21_s8 }
   0x4   :  { %s33_s28 = sshll.u32 %s631_s27, 4  ;;  %s632_s9 = smov 64   ;;  %s34_s28 = int_to_ptr.vmem [resolvable:$true] %s33_s28 }
   0x5   :  { %s633_s10 = smov 4   ;;  %s634_s11 = smov [#allocation2]  }
   0x6   :  { %39 = dma.hbm_to_vmem [thread:$0]  %s32_s26, 1024, %s34_s28, [#allocation6], %s632_s9, %s632_s9, %s633_s10  }
   0x7   :  { %s23_s12 = sshll.u32 %s634_s11, 4  ;;  %s46_s15 = sshll.u32 %s705_s3, 4  ;;  %s24_s12 = int_to_ptr.vmem [resolvable:$true] %s23_s12  ;;  %s47_s15 = int_to_ptr.hbm [resolvable:$true] %s46_s15 }
   0x8   :  { %26 = dma.hbm_to_vmem [thread:$0]  %s22_s8, 64, %s24_s12, [#allocation3]  }
   0x9   :  { %s61_s17 = sshll.u32 %s707_s5, 4  ;;  %s635_s18 = smov [#allocation7]   ;;  %s62_s17 = int_to_ptr.hbm [resolvable:$true] %s61_s17 }
   0xa   :  { %s48_s19 = sshll.u32 %s635_s18, 4  ;;  %s636_s0 = smov [#allocation8]   ;;  %s49_s19 = int_to_ptr.vmem [resolvable:$true] %s48_s19 }
   0xb   :  { %54 = dma.hbm_to_vmem [thread:$0]  %s47_s15, 1024, %s49_s19, [#allocation6], %s632_s9, %s632_s9, %s633_s10  }
   0xc   :  { %s63_s20 = sshll.u32 %s636_s0, 4  ;;  %s64_s20 = int_to_ptr.vmem [resolvable:$true] %s63_s20 }
   0xd   :  { %69 = dma.hbm_to_vmem [thread:$0]  %s62_s17, 1024, %s64_s20, [#allocation9], %s632_s9, %s632_s9, %s633_s10  }
   0xe   :  { %623 = dma.done.wait [#allocation3], 64  }
   0xf   :  { %624 = vsyncadd [#allocation3], 4294967232 }
  0x10   :  { %625 = dma.done.wait [#allocation6], 2048  }
  0x11   :  { %626 = vsyncadd [#allocation6], 4294965248 }
  0x12   :  { %627 = dma.done.wait [#allocation9], 1024  }
  0x13   :  { %628 = vsyncadd [#allocation9], 4294966272  ;;  %v472_v0 = vld [vmem:[#allocation5 + $0x38] sm:$0xff]  ;;  %v471_v1 = vld [vmem:[#allocation5 + $0x30] sm:$0xff]  ;;  %v336_v37 = vlaneseq }
  0x14   :  { %157 = vmatpush.bf16.msra.mxu0 %v472_v0  ;;  %v480_v2 = vld [vmem:[#allocation7 + $0x38] sm:$0xff]  ;;  %v479_v3 = vld [vmem:[#allocation7 + $0x30] sm:$0xff]  ;;  %v470_v4 = vld [vmem:[#allocation5 + $0x28] sm:$0xff] }
  0x15   :  { %240 = vmatpush.bf16.msra.mxu1 %v480_v2  ;;  %v478_v5 = vld [vmem:[#allocation7 + $0x28] sm:$0xff]  ;;  %v469_v6 = vld [vmem:[#allocation5 + $0x20] sm:$0xff]  ;;  %v468_v8 = vld [vmem:[#allocation5 + $0x18] sm:$0xff]  ;;  %v337_v38 = vand.u32 127, %v336_v37 }
  0x16   :  { %v477_v7 = vld [vmem:[#allocation7 + $0x20] sm:$0xff]  ;;  %v476_v9 = vld [vmem:[#allocation7 + $0x18] sm:$0xff]  ;;  %v467_v10 = vld [vmem:[#allocation5 + $0x10] sm:$0xff] }
  0x17   :  { %v475_v11 = vld [vmem:[#allocation7 + $0x10] sm:$0xff]  ;;  %v466_v12 = vld [vmem:[#allocation5 + $0x8] sm:$0xff]  ;;  %v465_v13 = vld [vmem:[#allocation5] sm:$0xff]  ;;  %vm338_vm0 = vcmp.lt.s32.totalorder %v337_v38, 8 }
  0x18   :  { %158 = vmatpush.bf16.msra.mxu0 %v471_v1  ;;  %v88_v14 = vld [vmem:[#allocation2] sm:$0xf]  ;;  %v474_v15 = vld [vmem:[#allocation7 + $0x8] sm:$0xff]  ;;  %v473_v16 = vld [vmem:[#allocation7] sm:$0xff] }
  0x19   :  { %241 = vmatpush.bf16.msra.mxu1 %v479_v3  ;;  %v488_v17 = vld [vmem:[#allocation8 + $0x38] sm:$0xff]  ;;  %v487_v18 = vld [vmem:[#allocation8 + $0x30] sm:$0xff]  ;;  %v486_v19 = vld [vmem:[#allocation8 + $0x28] sm:$0xff] }
  0x1a   :  { %323 = vmatpush.bf16.msra.mxu2 %v488_v17  ;;  %v485_v20 = vld [vmem:[#allocation8 + $0x20] sm:$0xff]  ;;  %v484_v21 = vld [vmem:[#allocation8 + $0x18] sm:$0xff]  ;;  %v483_v22 = vld [vmem:[#allocation8 + $0x10] sm:$0xff] }
  0x1b   :  { %v496_v23 = vld [vmem:[%s704_s2] ss:$0 sm:$0xff]  ;;  %v482_v29 = vld [vmem:[#allocation8 + $0x8] sm:$0xff]  ;;  %v481_v30 = vld [vmem:[#allocation8] sm:$0xff] }
  0x1c   :  { %159 = vmatpush.bf16.msra.mxu0 %v470_v4  ;;  %v497_v31 = vld [vmem:[%s706_s4] ss:$0 sm:$0xff]  ;;  %s637_s4 = smov [#allocation10]  }
  0x1d   :  { %242 = vmatpush.bf16.msra.mxu1 %v478_v5  ;;  %v498_v39 = vld [vmem:[%s708_s6] ss:$0 sm:$0xff]  ;;  %s355_s24 = sshll.u32 %s637_s4, 4  ;;  %s357_s6 = sshll.u32 %s709_s7, 4  ;;  %s356_s24 = int_to_ptr.vmem [resolvable:$true] %s355_s24  ;;  %s358_s6 = int_to_ptr.hbm [resolvable:$true] %s357_s6 }
  0x1e   :  { %324 = vmatpush.bf16.msra.mxu2 %v487_v18 }
  0x20   :  { %160 = vmatpush.bf16.msra.mxu0 %v469_v6 }
  0x21   :  { %243 = vmatpush.bf16.msra.mxu1 %v477_v7 }
  0x22   :  { %325 = vmatpush.bf16.msra.mxu2 %v486_v19 }
  0x24   :  { %161 = vmatpush.bf16.msra.mxu0 %v468_v8 }
  0x25   :  { %244 = vmatpush.bf16.msra.mxu1 %v476_v9 }
  0x26   :  { %326 = vmatpush.bf16.msra.mxu2 %v485_v20 }
  0x28   :  { %162 = vmatpush.bf16.msra.mxu0 %v467_v10 }
  0x29   :  { %245 = vmatpush.bf16.msra.mxu1 %v475_v11 }
  0x2a   :  { %327 = vmatpush.bf16.msra.mxu2 %v484_v21 }
  0x2c   :  { %163 = vmatpush.bf16.msra.mxu0 %v466_v12 }
  0x2d   :  { %246 = vmatpush.bf16.msra.mxu1 %v474_v15 }
  0x2e   :  { %328 = vmatpush.bf16.msra.mxu2 %v483_v22 }
  0x30   :  { %164 = vmatpush.bf16.msra.mxu0 %v465_v13 }
  0x31   :  { %247 = vmatpush.bf16.msra.mxu1 %v473_v16 }
  0x32   :  { %329 = vmatpush.bf16.msra.mxu2 %v482_v29 }
  0x33   :  { %165 = vmatmul.bf16.vlgmr.msra.gmra.mxu0 %v88_v14 }
  0x36   :  { %330 = vmatpush.bf16.msra.mxu2 %v481_v30 }
  0xb0   :  { %v166_v24 = vpop.f32.mrf.mxu0 }
  0xb1   :  { %v167_v25 = vadd.f32 %v496_v23, %v166_v24 }
  0xb3   :  { %v170_v26 = vmax.f32 %v167_v25, 0.0 }
  0xb5   :  { %v171_v27 = vpack.c.bf16 %v170_v26, %v170_v26 }
  0xb7   :  { %248 = vmatmul.bf16.vlgmr.msra.gmra.mxu1 %v171_v27 }
  0xb8   :  { %v168_v28 = vpop.f32.mrf.mxu0 }
 0x134   :  { %v249_v32 = vpop.f32.mrf.mxu1 }
 0x135   :  { %v250_v33 = vadd.f32 %v497_v31, %v249_v32 }
 0x137   :  { %v253_v34 = vmax.f32 %v250_v33, 0.0 }
 0x139   :  { %v254_v35 = vpack.c.bf16 %v253_v34, %v253_v34 }
 0x13b   :  { %331 = vmatmul.bf16.vlgmr.msra.gmra.mxu2 %v254_v35 }
 0x13c   :  { %v251_v36 = vpop.f32.mrf.mxu1 }
 0x1be   :  { %v332_v40 = vpop.f32.mrf.mxu2 }
 0x1bf   :  { %v333_v41 = vadd.f32 %v498_v39, %v332_v40 }
 0x1c1   :  { %v339_v42 = vsel %vm338_vm0, %v333_v41, -inf }
 0x1c2   :  { %340 = vmax.xlane.f32.xlu0 %v339_v42 }
 0x1c6   :  { %v334_v43 = vpop.f32.mrf.mxu2 }
 0x235   :  { %v341_v44 = vpop.xlane.xlu0 %340 }
 0x236   :  { %v342_v45 = vsub.f32 %v339_v42, %v341_v44 }
 0x238   :  { %v343_v46 = vmul.f32 1.442695, %v342_v45 }
 0x23a   :  { %499 = vpow2.f32 %v343_v46 }
 0x240   :  { %v500_v47 = vpop.eup %499 }
 0x241   :  { %345 = vadd.xlane.f32.xlu0 %v500_v47 }
 0x2b4   :  { %v346_v48 = vpop.xlane.xlu0 %345 }
 0x2b5   :  { %501 = vrcp.f32 %v346_v48 }
 0x2bb   :  { %v502_v49 = vpop.eup %501 }
 0x2bc   :  { %v348_v50 = vmul.f32 %v502_v49, %v500_v47 }
 0x2be   :  { %349 = vst [vmem:[#allocation10] sm:$0xff] %v348_v50 }
 0x2bf   :  { %360 = dma.vmem_to_hbm [thread:$0]  %s356_s24, 128, %s358_s6, [#allocation4]  }
 0x2c0   :  { %629 = dma.done.wait [#allocation4], 128  }
 0x2c1   :  { %630 = vsyncadd [#allocation4], 4294967168 }
 0x2c2   :  { %365 = vsyncpa [#allocation3], 1 }
 0x2c3   :  { %366 = vsyncpa [#allocation6], 1 }
 0x2c4   :  { %367 = vsyncpa [#allocation9], 1 }
 0x2c5   :  { %368 = vsyncpa [#allocation4], 1 }

</bundles_post_ra>
